<compile_context>
chip_gen: v6e
topology: v6e:2x2x1
jax: 0.10.0
libtpu: 0.0.40
codegen_flags: <defaults>
</compile_context>

<pallas_src>
import functools

import jax
import jax.numpy as jnp
from jax.experimental import pallas as pl
from jax.experimental.pallas import tpu as pltpu


_SQRT_2_OVER_PI = 0.7978845608028654


def _gelu_tanh(x):
    # tanh-approximation GELU (GPT2 uses this form) -- kept in f32.
    return 0.5 * x * (1.0 + jnp.tanh(_SQRT_2_OVER_PI * (x + 0.044715 * x * x * x)))


def _round_up(x, m):
    return ((x + m - 1) // m) * m


def _tpu_vmem_capacity_bytes():
    try:
        return int(pltpu.get_tpu_info().vmem_capacity_bytes)
    except Exception:
        return 64 * 1024 * 1024  # assume the most-constrained generation (v7x)


_VMEM_CAP = _tpu_vmem_capacity_bytes()
# Leave ~16 MiB headroom for Mosaic scratch; clamp to ~48 MiB on v7x (64 MiB
# physical) and up to 96 MiB on 128 MiB v5e/v6e.
_VMEM_LIMIT = int(min(max(_VMEM_CAP - 16 * 1024 * 1024, 32 * 1024 * 1024),
                      96 * 1024 * 1024))
_MAX_V_TILE = 4096 if _VMEM_CAP >= 100 * 1024 * 1024 else 2048


def _choose_v_tiling(v, max_tile):
    """Lane-dense vocab tile + padded vocab size; guarantees >= 2 grid steps."""
    v128 = _round_up(v, 128)
    v_tile = max_tile
    while v_tile > 128 and v128 < 2 * v_tile:
        v_tile //= 2
    v_pad = max(_round_up(v, v_tile), 2 * v_tile)
    return v_tile, v_pad


# -----------------------------------------------------------------------------
# Kernel 1: feature path (runs once; whole arrays in VMEM, no grid).
# -----------------------------------------------------------------------------
def feature_kernel(img_ref, w_img_ref, txt_ref, w_gpt_ref, b_gpt_ref,
                   img_feat_ref, h_ref, *, batch, hw):
    # ---- image path: 1x1 conv (batch-fused matmul, K padded to 8) + ReLU ----
    feat = jnp.dot(img_ref[...], w_img_ref[...],
                   preferred_element_type=jnp.float32)           # (B*HW, Cimg) f32
    feat = jnp.maximum(feat, 0.0)

    # exact spatial mean-pool (== mean([2,3]) in NCHW), done once per batch elem
    rows = [jnp.mean(feat[b * hw:(b + 1) * hw, :], axis=0, keepdims=True)
            for b in range(batch)]
    pooled = jnp.concatenate(rows, axis=0) if batch > 1 else rows[0]   # (B, Cimg)
    img_feat_ref[...] = pooled.astype(img_feat_ref.dtype)

    # ---- text path: dense + tanh-GELU stand-in for GPT2 last_hidden_state ----
    h = jnp.dot(txt_ref[...], w_gpt_ref[...],
                preferred_element_type=jnp.float32)              # (B*S, Hg) f32
    h = _gelu_tanh(h + b_gpt_ref[...])
    h_ref[...] = h.astype(h_ref.dtype)


# -----------------------------------------------------------------------------
# Kernel 2: classifier, tiled over (padded) vocab; grid axis is "parallel".
# -----------------------------------------------------------------------------
def classifier_kernel(img_feat_ref, h_ref, w_cls_ref, b_cls_ref, out_ref,
                      *, cimg, hg, batch, seq):
    # single concatenated weight stream, split at a sublane-aligned boundary
    w_img_tile = w_cls_ref[pl.ds(0, cimg), :]        # (Cimg, Vt)
    w_txt_tile = w_cls_ref[pl.ds(cimg, hg), :]       # (Hg,   Vt)

    # ONE MXU pass for the image half (M = B), one for the text half (M = B*S)
    img_logits = jnp.dot(img_feat_ref[...], w_img_tile,
                         preferred_element_type=jnp.float32)     # (B, Vt)
    txt_logits = jnp.dot(h_ref[...], w_txt_tile,
                         preferred_element_type=jnp.float32)     # (B*S, Vt)

    acc = txt_logits + b_cls_ref[...]                            # bias broadcast
    for b in range(batch):   # static unroll; broadcast image logits over seq
        out_ref[pl.ds(b * seq, seq), :] = (
            acc[b * seq:(b + 1) * seq, :] + img_logits[b:b + 1, :]
        ).astype(out_ref.dtype)


# -----------------------------------------------------------------------------
# Wrapper
# -----------------------------------------------------------------------------
@jax.jit
def vqa_forward(images_nchw, question, params):
    """images_nchw: (B, Cin, H, W) float32; question: (B, S) int32 token ids."""
    B, Cin, H, W = images_nchw.shape
    S = question.shape[1]
    HW = H * W
    Cimg = params["w_img"].shape[1]
    Hg = params["w_gpt"].shape[0]
    V = params["b_cls"].shape[1]

    cin_p = max(8, _round_up(Cin, 8))
    cimg_p = _round_up(Cimg, 8)       # sublane-aligned split point in w_cls

    # NCHW -> channels-last flattened (B*HW, Cin); zero-pad K to a sublane
    # multiple; bf16 operands (zero padding keeps the matmul exact).
    img_flat = jnp.transpose(images_nchw, (0, 2, 3, 1)).reshape(B * HW, Cin)
    img_flat = jnp.pad(img_flat, ((0, 0), (0, cin_p - Cin))).astype(jnp.bfloat16)
    w_img = jnp.pad(params["w_img"],
                    ((0, cin_p - Cin), (0, cimg_p - Cimg))).astype(jnp.bfloat16)

    # GPT2 embedding lookup (glue, plain-JAX gather), batch flattened into rows.
    txt = (params["wte"][question] + params["wpe"][:S][None, :, :]).reshape(B * S, Hg)
    txt = txt.astype(jnp.bfloat16)
    w_gpt = params["w_gpt"].astype(jnp.bfloat16)
    b_gpt = params["b_gpt"].astype(jnp.float32)

    # ---- feature kernel: runs once, no vocab-tile recompute ----
    img_feat, h = pl.pallas_call(
        functools.partial(feature_kernel, batch=B, hw=HW),
        out_shape=(jax.ShapeDtypeStruct((B, cimg_p), jnp.bfloat16),
                   jax.ShapeDtypeStruct((B * S, Hg), jnp.bfloat16)),
    )(img_flat, w_img, txt, w_gpt, b_gpt)

    # ---- classifier kernel: lane-dense padded vocab tiles, >= 2 grid steps ----
    v_tile, v_pad = _choose_v_tiling(V, _MAX_V_TILE)
    w_cls = jnp.concatenate(
        [jnp.pad(params["w_cls_img"], ((0, cimg_p - Cimg), (0, 0))),
         params["w_cls_txt"]], axis=0)                        # (cimg_p + Hg, V)
    w_cls = jnp.pad(w_cls, ((0, 0), (0, v_pad - V))).astype(jnp.bfloat16)
    b_cls = jnp.pad(params["b_cls"], ((0, 0), (0, v_pad - V))).astype(jnp.float32)

    grid = (v_pad // v_tile,)
    kernel = functools.partial(classifier_kernel,
                               cimg=cimg_p, hg=Hg, batch=B, seq=S)

    out2d = pl.pallas_call(
        kernel,
        out_shape=jax.ShapeDtypeStruct((B * S, v_pad), jnp.float32),
        grid_spec=pltpu.PrefetchScalarGridSpec(
            num_scalar_prefetch=0,
            grid=grid,
            in_specs=[
                pl.BlockSpec((B, cimg_p), lambda j: (0, 0)),          # img_feat
                pl.BlockSpec((B * S, Hg), lambda j: (0, 0)),          # h
                pl.BlockSpec((cimg_p + Hg, v_tile), lambda j: (0, j)),  # w_cls tile
                pl.BlockSpec((1, v_tile), lambda j: (0, j)),          # b_cls tile
            ],
            out_specs=pl.BlockSpec((B * S, v_tile), lambda j: (0, j)),
        ),
        compiler_params=pltpu.CompilerParams(
            dimension_semantics=("parallel",),
            vmem_limit_bytes=_VMEM_LIMIT,
        ),
    )(img_feat, h, w_cls, b_cls)

    return out2d[:, :V].reshape(B, S, V)


# -----------------------------------------------------------------------------
# Plain-JAX reference (mirrors the PyTorch forward with the same stand-ins and
# the same bf16 operand casts as the kernels).
# -----------------------------------------------------------------------------
def reference_forward(images_nchw, question, params):
    B, Cin, H, W = images_nchw.shape
    S = question.shape[1]
    Hg = params["w_gpt"].shape[0]
    f32 = jnp.float32
    hp = jax.lax.Precision.HIGHEST

    img_flat = jnp.transpose(images_nchw, (0, 2, 3, 1)).reshape(B * H * W, Cin)
    img_flat = img_flat.astype(jnp.bfloat16).astype(f32)
    w_img = params["w_img"].astype(jnp.bfloat16).astype(f32)
    feat = jnp.maximum(jnp.dot(img_flat, w_img, precision=hp), 0.0)
    img_feat = feat.reshape(B, H * W, -1).mean(axis=1)                   # (B, Cimg)

    txt = (params["wte"][question] + params["wpe"][:S][None, :, :]).reshape(B * S, Hg)
    txt = txt.astype(jnp.bfloat16).astype(f32)
    w_gpt = params["w_gpt"].astype(jnp.bfloat16).astype(f32)
    h = _gelu_tanh(jnp.dot(txt, w_gpt, precision=hp) + params["b_gpt"])

    w_cls_img = params["w_cls_img"].astype(jnp.bfloat16).astype(f32)
    w_cls_txt = params["w_cls_txt"].astype(jnp.bfloat16).astype(f32)
    txt_logits = jnp.dot(h.astype(jnp.bfloat16).astype(f32), w_cls_txt, precision=hp)
    img_logits = jnp.dot(img_feat.astype(jnp.bfloat16).astype(f32), w_cls_img,
                         precision=hp)                                    # (B, V)
    img_logits = jnp.repeat(img_logits, S, axis=0)                        # (B*S, V)
    out = txt_logits + img_logits + params["b_cls"]
    return out.reshape(B, S, -1)


def make_params(key, vocab_size, cin, cimg, hg, max_pos):
    ks = jax.random.split(key, 7)
    scale = 0.02
    return {
        "w_img":     scale * jax.random.normal(ks[0], (cin, cimg), jnp.float32),
        "wte":       scale * jax.random.normal(ks[1], (vocab_size, hg), jnp.float32),
        "wpe":       scale * jax.random.normal(ks[2], (max_pos, hg), jnp.float32),
        "w_gpt":     scale * jax.random.normal(ks[3], (hg, hg), jnp.float32),
        "b_gpt":     jnp.zeros((1, hg), jnp.float32),
        "w_cls_img": scale * jax.random.normal(ks[4], (cimg, vocab_size), jnp.float32),
        "w_cls_txt": scale * jax.random.normal(ks[5], (hg, vocab_size), jnp.float32),
        "b_cls":     scale * jax.random.normal(ks[6], (1, vocab_size), jnp.float32),
    }


if __name__ == "__main__":
    # Small shapes consistent with the forward:
    #   images (B, 3, 16, 16), question (B, S) token ids, output (B, S, vocab).
    B, Cin, H, W = 2, 3, 16, 16
    S = 8
    vocab_size = 128   # stand-in for GPT2 vocab (50257)
    Cimg = 64          # stand-in for efficientnet._fc.in_features (1280)
    Hg = 64            # stand-in for gpt2.config.hidden_size (768)

    key = jax.random.PRNGKey(0)
    k_img, k_q, k_p = jax.random.split(key, 3)
    images = jax.random.normal(k_img, (B, Cin, H, W), jnp.float32)
    question = jax.random.randint(k_q, (B, S), 0, vocab_size, dtype=jnp.int32)
    params = make_params(k_p, vocab_size, Cin, Cimg, Hg, max_pos=32)

    out = vqa_forward(images, question, params)
    out = jax.block_until_ready(out)

    ref = reference_forward(images, question, params)
    assert out.shape == (B, S, vocab_size), out.shape
    max_err = float(jnp.max(jnp.abs(out - ref)))
    assert max_err < 2e-3, max_err
    print("KERNEL_OK")
</pallas_src>

<mosaic_0001>
module attributes {stable_mosaic.version = 11 : i64} {
  func.func @feature_kernel(%arg0: memref<512x8xbf16, #tpu.memory_space<vmem>>, %arg1: memref<8x64xbf16, #tpu.memory_space<vmem>>, %arg2: memref<16x64xbf16, #tpu.memory_space<vmem>>, %arg3: memref<64x64xbf16, #tpu.memory_space<vmem>>, %arg4: memref<1x64xf32, #tpu.memory_space<vmem>>, %arg5: memref<2x64xbf16, #tpu.memory_space<vmem>>, %arg6: memref<16x64xbf16, #tpu.memory_space<vmem>>) attributes {dimension_semantics = [], scalar_prefetch = 0 : i64, scratch_operands = 0 : i64, tpu.core_type = #tpu.core_type<tc>} {
    %c0 = arith.constant 0 : index
    %c0_0 = arith.constant 0 : index
    %0 = vector.load %arg0[%c0, %c0_0] : memref<512x8xbf16, #tpu.memory_space<vmem>>, vector<512x8xbf16>
    %c0_1 = arith.constant 0 : index
    %c0_2 = arith.constant 0 : index
    %1 = vector.load %arg1[%c0_1, %c0_2] : memref<8x64xbf16, #tpu.memory_space<vmem>>, vector<8x64xbf16>
    %cst = arith.constant dense<0.000000e+00> : vector<512x64xf32>
    %2 = tpu.matmul %0, %1, %cst {dimension_numbers = #tpu.dot_dimension_numbers<[1], [0], [0], [1], [0, 0, 1, 1], [], []>} : vector<512x8xbf16>, vector<8x64xbf16>, vector<512x64xf32> -> vector<512x64xf32>
    %cst_3 = arith.constant 0.000000e+00 : f32
    %3 = vector.broadcast %cst_3 : f32 to vector<512x64xf32>
    %4 = arith.maximumf %2, %3 : vector<512x64xf32>
    %5 = vector.extract_strided_slice %4 {offsets = [0, 0], sizes = [256, 64], strides = [1, 1]} : vector<512x64xf32> to vector<256x64xf32>
    %cst_4 = arith.constant dense<0.000000e+00> : vector<64xf32>
    %6 = vector.multi_reduction <add>, %5, %cst_4 [0] : vector<256x64xf32> to vector<64xf32>
    %7 = vector.shape_cast %6 : vector<64xf32> to vector<1x64xf32>
    %cst_5 = arith.constant 2.560000e+02 : f32
    %8 = vector.broadcast %cst_5 : f32 to vector<1x64xf32>
    %9 = arith.divf %7, %8 : vector<1x64xf32>
    %10 = vector.extract_strided_slice %4 {offsets = [256, 0], sizes = [256, 64], strides = [1, 1]} : vector<512x64xf32> to vector<256x64xf32>
    %cst_6 = arith.constant dense<0.000000e+00> : vector<64xf32>
    %11 = vector.multi_reduction <add>, %10, %cst_6 [0] : vector<256x64xf32> to vector<64xf32>
    %12 = vector.shape_cast %11 : vector<64xf32> to vector<1x64xf32>
    %cst_7 = arith.constant 2.560000e+02 : f32
    %13 = vector.broadcast %cst_7 : f32 to vector<1x64xf32>
    %14 = arith.divf %12, %13 : vector<1x64xf32>
    %15 = tpu.concatenate %9, %14 in 0 : vector<1x64xf32>, vector<1x64xf32> -> vector<2x64xf32>
    %16 = arith.truncf %15 : vector<2x64xf32> to vector<2x64xbf16>
    %c0_8 = arith.constant 0 : index
    %c0_9 = arith.constant 0 : index
    %17 = vector.load %arg5[%c0_8, %c0_9] : memref<2x64xbf16, #tpu.memory_space<vmem>>, vector<2x64xbf16>
    tpu.vector_store %arg5[%c0_8, %c0_9], %16 {strides = array<i32>} : memref<2x64xbf16, #tpu.memory_space<vmem>>, vector<2x64xbf16>,
    %c0_10 = arith.constant 0 : index
    %c0_11 = arith.constant 0 : index
    %18 = vector.load %arg2[%c0_10, %c0_11] : memref<16x64xbf16, #tpu.memory_space<vmem>>, vector<16x64xbf16>
    %c0_12 = arith.constant 0 : index
    %c0_13 = arith.constant 0 : index
    %19 = vector.load %arg3[%c0_12, %c0_13] : memref<64x64xbf16, #tpu.memory_space<vmem>>, vector<64x64xbf16>
    %cst_14 = arith.constant dense<0.000000e+00> : vector<16x64xf32>
    %20 = tpu.matmul %18, %19, %cst_14 {dimension_numbers = #tpu.dot_dimension_numbers<[1], [0], [0], [1], [0, 0, 1, 1], [], []>} : vector<16x64xbf16>, vector<64x64xbf16>, vector<16x64xf32> -> vector<16x64xf32>
    %c0_15 = arith.constant 0 : index
    %c0_16 = arith.constant 0 : index
    %21 = vector.load %arg4[%c0_15, %c0_16] : memref<1x64xf32, #tpu.memory_space<vmem>>, vector<1x64xf32>
    %22 = vector.broadcast %21 : vector<1x64xf32> to vector<16x64xf32>
    %23 = arith.addf %20, %22 : vector<16x64xf32>
    %cst_17 = arith.constant 5.000000e-01 : f32
    %24 = vector.broadcast %cst_17 : f32 to vector<16x64xf32>
    %25 = arith.mulf %24, %23 : vector<16x64xf32>
    %cst_18 = arith.constant 4.471500e-02 : f32
    %26 = vector.broadcast %cst_18 : f32 to vector<16x64xf32>
    %27 = arith.mulf %26, %23 : vector<16x64xf32>
    %28 = arith.mulf %27, %23 : vector<16x64xf32>
    %29 = arith.mulf %28, %23 : vector<16x64xf32>
    %30 = arith.addf %23, %29 : vector<16x64xf32>
    %cst_19 = arith.constant 0.797884583 : f32
    %31 = vector.broadcast %cst_19 : f32 to vector<16x64xf32>
    %32 = arith.mulf %31, %30 : vector<16x64xf32>
    %33 = math.tanh %32 : vector<16x64xf32>
    %cst_20 = arith.constant 1.000000e+00 : f32
    %34 = vector.broadcast %cst_20 : f32 to vector<16x64xf32>
    %35 = arith.addf %34, %33 : vector<16x64xf32>
    %36 = arith.mulf %25, %35 : vector<16x64xf32>
    %37 = arith.truncf %36 : vector<16x64xf32> to vector<16x64xbf16>
    %c0_21 = arith.constant 0 : index
    %c0_22 = arith.constant 0 : index
    %38 = vector.load %arg6[%c0_21, %c0_22] : memref<16x64xbf16, #tpu.memory_space<vmem>>, vector<16x64xbf16>
    tpu.vector_store %arg6[%c0_21, %c0_22], %37 {strides = array<i32>} : memref<16x64xbf16, #tpu.memory_space<vmem>>, vector<16x64xbf16>,
    return
  }
}

module attributes {stable_mosaic.version = 11 : i64} {
  func.func @classifier_kernel(%arg0: i32, %arg1: memref<2x64xbf16, #tpu.memory_space<vmem>>, %arg2: memref<16x64xbf16, #tpu.memory_space<vmem>>, %arg3: memref<128x128xbf16, #tpu.memory_space<vmem>>, %arg4: memref<1x128xf32, #tpu.memory_space<vmem>>, %arg5: memref<16x128xf32, #tpu.memory_space<vmem>>) attributes {dimension_semantics = [#tpu.dimension_semantics<parallel>], iteration_bounds = array<i64: 2>, scalar_prefetch = 0 : i64, scratch_operands = 0 : i64, tpu.core_type = #tpu.core_type<tc>, window_params = [{pipeline_mode = #tpu.pipeline_mode<synchronous>, transform_indices = @transform_0, window_bounds = array<i64: 2, 64>}, {pipeline_mode = #tpu.pipeline_mode<synchronous>, transform_indices = @transform_1, window_bounds = array<i64: 16, 64>}, {transform_indices = @transform_2, window_bounds = array<i64: 128, 128>}, {transform_indices = @transform_3, window_bounds = array<i64: 1, 128>}, {transform_indices = @transform_4, window_bounds = array<i64: 16, 128>}]} {
    %c0 = arith.constant 0 : index
    %c0_0 = arith.constant 0 : index
    %0 = vector.load %arg3[%c0, %c0_0] : memref<128x128xbf16, #tpu.memory_space<vmem>>, vector<64x128xbf16>
    %c64 = arith.constant 64 : index
    %c0_1 = arith.constant 0 : index
    %1 = vector.load %arg3[%c64, %c0_1] : memref<128x128xbf16, #tpu.memory_space<vmem>>, vector<64x128xbf16>
    %c0_2 = arith.constant 0 : index
    %c0_3 = arith.constant 0 : index
    %2 = vector.load %arg1[%c0_2, %c0_3] : memref<2x64xbf16, #tpu.memory_space<vmem>>, vector<2x64xbf16>
    %cst = arith.constant dense<0.000000e+00> : vector<2x128xf32>
    %3 = tpu.matmul %2, %0, %cst {dimension_numbers = #tpu.dot_dimension_numbers<[1], [0], [0], [1], [0, 0, 1, 1], [], []>} : vector<2x64xbf16>, vector<64x128xbf16>, vector<2x128xf32> -> vector<2x128xf32>
    %c0_4 = arith.constant 0 : index
    %c0_5 = arith.constant 0 : index
    %4 = vector.load %arg2[%c0_4, %c0_5] : memref<16x64xbf16, #tpu.memory_space<vmem>>, vector<16x64xbf16>
    %cst_6 = arith.constant dense<0.000000e+00> : vector<16x128xf32>
    %5 = tpu.matmul %4, %1, %cst_6 {dimension_numbers = #tpu.dot_dimension_numbers<[1], [0], [0], [1], [0, 0, 1, 1], [], []>} : vector<16x64xbf16>, vector<64x128xbf16>, vector<16x128xf32> -> vector<16x128xf32>
    %c0_7 = arith.constant 0 : index
    %c0_8 = arith.constant 0 : index
    %6 = vector.load %arg4[%c0_7, %c0_8] : memref<1x128xf32, #tpu.memory_space<vmem>>, vector<1x128xf32>
    %7 = vector.broadcast %6 : vector<1x128xf32> to vector<16x128xf32>
    %8 = arith.addf %5, %7 : vector<16x128xf32>
    %9 = vector.extract_strided_slice %8 {offsets = [0, 0], sizes = [8, 128], strides = [1, 1]} : vector<16x128xf32> to vector<8x128xf32>
    %10 = vector.extract_strided_slice %3 {offsets = [0, 0], sizes = [1, 128], strides = [1, 1]} : vector<2x128xf32> to vector<1x128xf32>
    %11 = vector.broadcast %10 : vector<1x128xf32> to vector<8x128xf32>
    %12 = arith.addf %9, %11 : vector<8x128xf32>
    %c0_9 = arith.constant 0 : index
    %c0_10 = arith.constant 0 : index
    %13 = vector.load %arg5[%c0_9, %c0_10] : memref<16x128xf32, #tpu.memory_space<vmem>>, vector<8x128xf32>
    tpu.vector_store %arg5[%c0_9, %c0_10], %12 {strides = array<i32>} : memref<16x128xf32, #tpu.memory_space<vmem>>, vector<8x128xf32>,
    %14 = vector.extract_strided_slice %8 {offsets = [8, 0], sizes = [8, 128], strides = [1, 1]} : vector<16x128xf32> to vector<8x128xf32>
    %15 = vector.extract_strided_slice %3 {offsets = [1, 0], sizes = [1, 128], strides = [1, 1]} : vector<2x128xf32> to vector<1x128xf32>
    %16 = vector.broadcast %15 : vector<1x128xf32> to vector<8x128xf32>
    %17 = arith.addf %14, %16 : vector<8x128xf32>
    %c8 = arith.constant 8 : index
    %c0_11 = arith.constant 0 : index
    %18 = vector.load %arg5[%c8, %c0_11] : memref<16x128xf32, #tpu.memory_space<vmem>>, vector<8x128xf32>
    tpu.vector_store %arg5[%c8, %c0_11], %17 {strides = array<i32>} : memref<16x128xf32, #tpu.memory_space<vmem>>, vector<8x128xf32>,
    return
  }
  func.func @transform_0(%arg0: i32) -> (i32, i32) {
    %c0_i32 = arith.constant 0 : i32
    %c0_i32_0 = arith.constant 0 : i32
    %c0_i32_1 = arith.constant 0 : i32
    return %c0_i32, %c0_i32_0 : i32, i32
  }
  func.func @transform_1(%arg0: i32) -> (i32, i32) {
    %c0_i32 = arith.constant 0 : i32
    %c0_i32_0 = arith.constant 0 : i32
    %c0_i32_1 = arith.constant 0 : i32
    return %c0_i32, %c0_i32_0 : i32, i32
  }
  func.func @transform_2(%arg0: i32) -> (i32, i32) {
    %c0_i32 = arith.constant 0 : i32
    %c0_i32_0 = arith.constant 0 : i32
    return %c0_i32, %arg0 : i32, i32
  }
  func.func @transform_3(%arg0: i32) -> (i32, i32) {
    %c0_i32 = arith.constant 0 : i32
    %c0_i32_0 = arith.constant 0 : i32
    return %c0_i32, %arg0 : i32, i32
  }
  func.func @transform_4(%arg0: i32) -> (i32, i32) {
    %c0_i32 = arith.constant 0 : i32
    %c0_i32_0 = arith.constant 0 : i32
    return %c0_i32, %arg0 : i32, i32
  }
}

</mosaic_0001>

<bundles_post_ra>
// kernel: vqa_forward.3
= control target key start
LH: loop header
LB: loop body
LE: loop exit
PB: predicated region body
PF: predicated region fallthrough
CT: control target
= control target key end

     0   :  { %s745_s15 = smov 0   ;;  %s747_s16 = smov 0   ;;  %s838_s0 = inlined_call_operand.vmem [shape: bf16[2,64], index: 0, kind: input, shape index: {}]   ;;  %s839_s1 = inlined_call_operand.vmem [shape: bf16[16,64], index: 1, kind: input, shape index: {}]   ;;  %s840_s2 = inlined_call_operand.vmem [shape: bf16[128,256], index: 2, kind: input, shape index: {}]   ;;  %s841_s3 = inlined_call_operand.vmem [shape: f32[1,256], index: 3, kind: input, shape index: {}]   ;;  %s842_s4 = inlined_call_operand.vmem [shape: f32[16,256], index: 4, kind: output, shape index: {}]  }
   0x1   :  { %s749_s17 = smov 0  }
   0x2 LB: > { %s761_s18 = sadd.s32 4294967295, %s716_s17   ;;  %s764_s19 = sadd.s32 1, %s716_s17   ;;  %s716_s17 = sphi %s749_s17, %s846_s17   ;;  %s712_s16 = sphi %s747_s16, %s845_s16   ;;  %s708_s15 = sphi %s745_s15, %s844_s15  }
   0x3   : > { %s60_s20 = ssub.s32 %s716_s17, %s764_s19  ;;  %s63_s21 = sadd.s32 1, %s712_s16 }
   0x4   : > { %p61_p0 = scmp.eq.s32.totalorder %s60_s20, 0  ;;  %p70_p1 = scmp.ne.s32.totalorder %s712_s16, %s708_s15 }
   0x5   : > { %p71_p2 = scmp.eq.s32.totalorder %s716_s17, 0  ;;  %p126_p3 = scmp.eq.s32.totalorder %s761_s18, 1 }
   0x6   : > { %s774_s22 = scalar_select %p61_p0, %s712_s16, %s63_s21  }
   0x7   : > { %p72_p4 = por %p71_p2, %p70_p1  ;;  %p776_p5 = por %p126_p3, %p70_p1 }
   0x8   : > { %p603_p6 = scmp.ge.s32.totalorder %s716_s17, 2 }
   0xa   : > { %154 = sbr.rel (%p603_p6) target bundleno = 29 (0x1d), region = 24 }
   0xf   : > { %157 = sbr.rel (!%p72_p4) target bundleno = 29 (0x1d), region = 28  ;;  %s159_s24 = sand.u32 (%p72_p4), 1, %s712_s16  }
  0x10   : > { %s605_s25 = sshll.u32 (%p72_p4), %s716_s17, 2  ;;  %s604_s26 = sshll.u32 (%p72_p4), %s159_s24, 6 }
  0x11   : > { %s786_s29 = scalar_lea.vmem (%p72_p4), %s840_s2, %s605_s25  ;;  %s161_s30 = scalar_lea.vmem (%p72_p4), [#allocation2], %s604_s26 }
  0x12   : > { %v180_v0 = vld [vmem:[%s786_s29] sm:$0xf] (%p72_p4)  ;;  %v182_v1 = vld [vmem:[%s786_s29 + $0x8] sm:$0xf] (%p72_p4)  ;;  %v184_v2 = vld [vmem:[%s786_s29 + $0x10] sm:$0xf] (%p72_p4) }
  0x13   : > { %181 = vst [vmem:[%s161_s30] sm:$0xf] (%p72_p4), %v180_v0  ;;  %183 = vst [vmem:[%s161_s30 + $0x4] sm:$0xf] (%p72_p4), %v182_v1  ;;  %v186_v3 = vld [vmem:[%s786_s29 + $0x18] sm:$0xf] (%p72_p4) }
  0x14   : > { %v188_v4 = vld [vmem:[%s786_s29 + $0x20] sm:$0xf]  ;;  %185 = vst [vmem:[%s161_s30 + $0x8] sm:$0xf] %v184_v2  ;;  %187 = vst [vmem:[%s161_s30 + $0xc] sm:$0xf] %v186_v3 }
  0x15   : > { %189 = vst [vmem:[%s161_s30 + $0x10] sm:$0xf] %v188_v4  ;;  %v190_v5 = vld [vmem:[%s786_s29 + $0x28] sm:$0xf]  ;;  %v192_v6 = vld [vmem:[%s786_s29 + $0x30] sm:$0xf] }
  0x16   : > { %v194_v7 = vld [vmem:[%s786_s29 + $0x38] sm:$0xf]  ;;  %191 = vst [vmem:[%s161_s30 + $0x14] sm:$0xf] %v190_v5  ;;  %193 = vst [vmem:[%s161_s30 + $0x18] sm:$0xf] %v192_v6 }
  0x17   : > { %195 = vst [vmem:[%s161_s30 + $0x1c] sm:$0xf] %v194_v7  ;;  %v196_v8 = vld [vmem:[%s786_s29 + $0x40] sm:$0xf]  ;;  %v198_v9 = vld [vmem:[%s786_s29 + $0x48] sm:$0xf] }
  0x18   : > { %v200_v10 = vld [vmem:[%s786_s29 + $0x50] sm:$0xf]  ;;  %197 = vst [vmem:[%s161_s30 + $0x20] sm:$0xf] %v196_v8  ;;  %199 = vst [vmem:[%s161_s30 + $0x24] sm:$0xf] %v198_v9 }
  0x19   : > { %201 = vst [vmem:[%s161_s30 + $0x28] sm:$0xf] %v200_v10  ;;  %v202_v11 = vld [vmem:[%s786_s29 + $0x58] sm:$0xf]  ;;  %v204_v12 = vld [vmem:[%s786_s29 + $0x60] sm:$0xf] }
  0x1a   : > { %v206_v13 = vld [vmem:[%s786_s29 + $0x68] sm:$0xf]  ;;  %203 = vst [vmem:[%s161_s30 + $0x2c] sm:$0xf] %v202_v11  ;;  %205 = vst [vmem:[%s161_s30 + $0x30] sm:$0xf] %v204_v12 }
  0x1b   : > { %207 = vst [vmem:[%s161_s30 + $0x34] sm:$0xf] %v206_v13  ;;  %v208_v14 = vld [vmem:[%s786_s29 + $0x70] sm:$0xf]  ;;  %v210_v15 = vld [vmem:[%s786_s29 + $0x78] sm:$0xf] }
  0x1c   : > { %209 = vst [vmem:[%s161_s30 + $0x38] sm:$0xf] %v208_v14  ;;  %211 = vst [vmem:[%s161_s30 + $0x3c] sm:$0xf] %v210_v15 }
  0x1d PF: > { %p606_p7 = scmp.ge.s32.totalorder %s716_s17, 1  ;;  %p272_p8 = scmp.lt.s32.totalorder %s716_s17, 3 }
  0x1f   : > { %p273_p9 = pnand %p606_p7, %p272_p8 }
  0x20   : > { %s279_s5 = sand.u32 (!%p273_p9), 1, %s708_s15   ;;  %p306_p10 = scmp.lt.s32.totalorder (!%p273_p9), %s761_s18, 1 }
  0x21   : > { %276 = sbr.rel (%p273_p9) target bundleno = 266 (0x10a), region = 73  ;;  %s607_s6 = sshll.u32 (!%p273_p9), %s279_s5, 6 }
  0x22   : > { %s281_s7 = scalar_lea.vmem (!%p273_p9), [#allocation2], %s607_s6  ;;  %s608_s20 = sshll.u32 (!%p273_p9), %s279_s5, 4 }
  0x23   : > { %s305_s21 = scalar_lea.vmem (!%p273_p9), [#allocation3], %s608_s20 }
  0x26   : > { %v718_v16 = vmov 0.0   ;;  %vm719_vm0 = vmmov 0   ;;  %v685_v17 = vld [vmem:[%s281_s7 + $0x18] sm:$0xff]   ;;  %v687_v19 = vld [vmem:[%s281_s7 + $0x10] sm:$0xff]   ;;  %v689_v21 = vld [vmem:[%s281_s7 + $0x8] sm:$0xff]   ;;  %vm351_vm1 = vcmask 523264   ;;  %v477_v27 = vlaneseq }
  0x27   : > { %635 = vmatprep.subr.bf16.mxu0 %v718_v16  ;;  %647 = vmatprep.subr.bf16.mxu1 %v718_v16  ;;  %v686_v18 = vld [vmem:[%s281_s7 + $0x38] sm:$0xff]   ;;  %v688_v20 = vld [vmem:[%s281_s7 + $0x30] sm:$0xff]   ;;  %v690_v22 = vld [vmem:[%s281_s7 + $0x28] sm:$0xff]   ;;  %s307_s12 = scalar_select %p306_p10, %s761_s18, 1 }
  0x28   : > { %643 = vmatprep.mubr.msk.bf16.mxu0 %vm719_vm0, %v718_v16  ;;  %655 = vmatprep.mubr.msk.bf16.mxu1 %vm719_vm0, %v718_v16  ;;  %v691_v23 = vld [vmem:[%s281_s7] sm:$0xff]   ;;  %v478_v28 = vshrl.u32 %v477_v27, 7  ;;  %s622_s15 = sshll.u32 (%p776_p5), %s761_s18, 3 }
  0x29   : > { %636 = vmatpush3.bf16.msra.mxu0 %v685_v17  ;;  %648 = vmatpush3.bf16.msra.mxu1 %v686_v18  ;;  %v692_v24 = vld [vmem:[%s281_s7 + $0x20] sm:$0xff]   ;;  %s308_s17 = scalar_lea.vmem %s841_s3, %s307_s12  ;;  %s497_s26 = scalar_lea.vmem (%p776_p5), %s842_s4, %s622_s15 }
  0x2a   : > { %637 = vmatprep.subr.bf16.mxu0 %v718_v16  ;;  %649 = vmatprep.subr.bf16.mxu1 %v718_v16  ;;  %v326_v25 = vld [vmem:[%s838_s0] sm:$0x1]  ;;  %v479_v29 = vsub.s32 0, %v478_v28  ;;  %v485_v32 = vsub.s32 1, %v478_v28 }
  0x2b   : > { %v693_v26 = vld [vmem:[%s839_s1] sm:$0xff]  }
  0x2c   : > { %v614_v30 = vld [vmem:[%s308_s17] ss:$0 sm:$0xff] }
  0x2d   : > { %638 = vmatpush3.bf16.msra.mxu0 %v687_v19  ;;  %650 = vmatpush3.bf16.msra.mxu1 %v688_v20 }
  0x2e   : > { %639 = vmatprep.subr.bf16.mxu0 %v718_v16  ;;  %651 = vmatprep.subr.bf16.mxu1 %v718_v16 }
  0x31   : > { %640 = vmatpush3.bf16.msra.mxu0 %v689_v21  ;;  %652 = vmatpush3.bf16.msra.mxu1 %v690_v22 }
  0x32   : > { %641 = vmatprep.subr.bf16.mxu0 %v718_v16  ;;  %653 = vmatprep.subr.bf16.mxu1 %v718_v16 }
  0x35   : > { %642 = vmatpush3.bf16.msra.mxu0 %v691_v23  ;;  %654 = vmatpush3.bf16.msra.mxu1 %v692_v24 }
  0x38   : > { %644 = vmatmul.mubr.msk.bf16.vlgmr.msra.gmra.mxu0 %vm351_vm1, %v326_v25  ;;  %656 = vmatmul.mubr.msk.bf16.vlgmr.msra.gmra.mxu1 %vm351_vm1, %v693_v26 }
  0xf8   : > { %v389_v31 = vpop.f32.mrf.mxu0  ;;  %v470_v34 = vpop.f32.mrf.mxu1 }
  0xf9   : > { %v480_v33 = vrot.slane %v389_v31, %v479_v29  ;;  %v471_v35 = vadd.f32 %v614_v30, %v470_v34  ;;  %v486_v38 = vrot.slane %v389_v31, %v485_v32 }
  0xfa   : > { %v645_v36 = vpop.f32.mrf.mxu0  ;;  %v657_v37 = vpop.f32.mrf.mxu1 }
  0xfb   : > { %v481_v39 = vadd.f32 %v480_v33, %v471_v35 }
  0xfc   : > { %v392_v40 = vpop.f32.mrf.mxu0  ;;  %v473_v41 = vpop.f32.mrf.mxu1 }
  0xfd   : > { %482 = vst [vmem:[%s305_s21] sm:$0xff] %v481_v39  ;;  %v474_v42 = vadd.f32 %v614_v30, %v473_v41  ;;  %495 = sbr.rel (!%p776_p5) target bundleno = 266 (0x10a), region = 81 }
  0xfe   : > { %v646_v43 = vpop.f32.mrf.mxu0  ;;  %v658_v44 = vpop.f32.mrf.mxu1 }
  0xff   : > { %v487_v45 = vadd.f32 %v486_v38, %v474_v42 }
 0x101   : > { %488 = vst [vmem:[%s305_s21 + $0x8] sm:$0xff] %v487_v45 }
 0x104   : > { %v528_v46 = vld [vmem:[%s305_s21] sm:$0xff] }
 0x105   : > { %529 = vst [vmem:[%s497_s26] sm:$0xff] %v528_v46 }
 0x108   : > { %v530_v47 = vld [vmem:[%s305_s21 + $0x8] sm:$0xff] }
 0x109   : > { %531 = vst [vmem:[%s497_s26 + $0x10] sm:$0xff] %v530_v47 }
 0x10a PF: > { %p11_p11 = scmp.ge.s32.totalorder %s764_s19, 4   ;;  %s844_s15 = smov %s712_s16 }
 0x10b   : > { %s845_s16 = smov %s774_s22  ;;  %s846_s17 = smov %s764_s19 }
 0x10c   :  { %13 = sbr.rel (!%p11_p11) target bundleno = 2 (0x2), region = 153 }

// kernel: vqa_forward.2
= control target key start
LH: loop header
LB: loop body
LE: loop exit
PB: predicated region body
PF: predicated region fallthrough
CT: control target
= control target key end

     0   :  { %vm345_vm0 = vcmask 1043456   ;;  %vm248_vm1 = vcmask 64512   ;;  %v1214_v5 = vmov 0.0   ;;  %vm1215_vm2 = vmmov 0   ;;  %s1569_s1 = inlined_call_operand.vmem [shape: bf16[8,64], index: 1, kind: input, shape index: {}]   ;;  %s1570_s0 = inlined_call_operand.vmem [shape: bf16[512,8], index: 0, kind: input, shape index: {}]   ;;  %s1571_s3 = inlined_call_operand.vmem [shape: bf16[64,64], index: 3, kind: input, shape index: {}]   ;;  %s1572_s2 = inlined_call_operand.vmem [shape: bf16[16,64], index: 2, kind: input, shape index: {}]   ;;  %s1573_s4 = inlined_call_operand.vmem [shape: f32[1,64], index: 4, kind: input, shape index: {}]   ;;  %s1574_s6 = inlined_call_operand.vmem [shape: bf16[16,64], index: 6, kind: output, shape index: {1}]   ;;  %s1575_s5 = inlined_call_operand.vmem [shape: bf16[2,64], index: 5, kind: output, shape index: {0}]  }
   0x1   :  { %v87_v0 = vld [vmem:[%s1569_s1] sm:$0xf]  ;;  %v1174_v3 = vld [vmem:[%s1570_s0 + $0x8] sm:$0xff]   ;;  %v1175_v4 = vld [vmem:[%s1570_s0 + $0x10] sm:$0xff]   ;;  %vm702_vm3 = vcmask 523264   ;;  %vm965_vm4 = vcmask 519168  }
   0x2   :  { %1169 = vmatprep.subr.msk.bf16.mxu0 %vm345_vm0, %v87_v0  ;;  %v347_v1 = vsel %vm345_vm0, %v87_v0, 0  ;;  %v1173_v2 = vld [vmem:[%s1570_s0] sm:$0xff]   ;;  %1170 = vmatprep.subr.msk.bf16.mxu1 %vm345_vm0, %v87_v0  ;;  %v1176_v6 = vld [vmem:[%s1570_s0 + $0x18] sm:$0xff]   ;;  %v1182_v8 = vld [vmem:[%s1570_s0 + $0x90] sm:$0xff]   ;;  %vm844_vm5 = vcmask 1040384   ;;  %vm847_vm6 = vcmask 516096  }
   0x3   :  { %1090 = vmatpush3.bf16.msra.mxu0 %v347_v1  ;;  %1168 = vmatpush3.bf16.msra.mxu1 %v347_v1  ;;  %v1177_v7 = vld [vmem:[%s1570_s0 + $0x20] sm:$0xff]   ;;  %v1184_v9 = vld [vmem:[%s1570_s0 + $0x98] sm:$0xff]   ;;  %v1178_v11 = vld [vmem:[%s1570_s0 + $0x28] sm:$0xff]  }
   0x4   :  { %1091 = vmatprep.mubr.msk.bf16.mxu0 %vm248_vm1, %v1173_v2  ;;  %1155 = vmatprep.subr.bf16.mxu1 %v1214_v5  ;;  %v1186_v10 = vld [vmem:[%s1570_s0 + $0xa0] sm:$0xff]   ;;  %v1179_v12 = vld [vmem:[%s1570_s0 + $0x30] sm:$0xff]   ;;  %v1188_v13 = vld [vmem:[%s1570_s0 + $0xa8] sm:$0xff]  }
   0x5   :  { %1127 = vmatprep.mubr.msk.bf16.mxu1 %vm248_vm1, %v1182_v8  ;;  %v1190_v14 = vld [vmem:[%s1570_s0 + $0xb0] sm:$0xff]   ;;  %v1180_v15 = vld [vmem:[%s1570_s0 + $0x38] sm:$0xff]   ;;  %v1181_v16 = vld [vmem:[%s1570_s0 + $0x40] sm:$0xff]  }
   0x6   :  { %1092 = vmatmul.mubr.msk.bf16.vlgmr.msra.gmra.mxu0 %vm248_vm1, %v1174_v3  ;;  %1128 = vmatmul.mubr.msk.bf16.vlgmr.msra.gmra.mxu1 %vm248_vm1, %v1184_v9  ;;  %v1197_v17 = vld [vmem:[%s1571_s3 + $0x18] sm:$0xff]   ;;  %v1194_v19 = vld [vmem:[%s1570_s0 + $0xc0] sm:$0xff]   ;;  %v1183_v20 = vld [vmem:[%s1570_s0 + $0x48] sm:$0xff]  }
   0x7   :  { %1095 = vmatprep.mubr.msk.bf16.mxu0 %vm248_vm1, %v1175_v4  ;;  %1131 = vmatprep.mubr.msk.bf16.mxu1 %vm248_vm1, %v1186_v10  ;;  %v1192_v18 = vld [vmem:[%s1570_s0 + $0xb8] sm:$0xff]   ;;  %v1185_v21 = vld [vmem:[%s1570_s0 + $0x50] sm:$0xff]   ;;  %v1196_v23 = vld [vmem:[%s1570_s0 + $0xc8] sm:$0xff]  }
   0x8   :  { %1156 = vmatpush3.bf16.msra.mxu1 %v1197_v17  ;;  %v1204_v22 = vld [vmem:[%s1571_s3 + $0x10] sm:$0xff]   ;;  %v1207_v25 = vld [vmem:[%s1571_s3 + $0x8] sm:$0xff]   ;;  %v1208_v26 = vld [vmem:[%s1571_s3] sm:$0xff]  }
   0x9   :  { %1157 = vmatprep.subr.bf16.mxu1 %v1214_v5  ;;  %v1199_v24 = vld [vmem:[%s1570_s0 + $0xd0] sm:$0xff]   ;;  %v1187_v27 = vld [vmem:[%s1570_s0 + $0x58] sm:$0xff]   ;;  %v1189_v28 = vld [vmem:[%s1570_s0 + $0x60] sm:$0xff]  }
   0xa   :  { %v1201_v29 = vld [vmem:[%s1570_s0 + $0xd8] sm:$0xff]   ;;  %v1202_v30 = vld [vmem:[%s1570_s0 + $0xe0] sm:$0xff]   ;;  %v1191_v31 = vld [vmem:[%s1570_s0 + $0x68] sm:$0xff]  }
   0xb   :  { %v1193_v32 = vld [vmem:[%s1570_s0 + $0x70] sm:$0xff]   ;;  %v1203_v33 = vld [vmem:[%s1570_s0 + $0xe8] sm:$0xff]   ;;  %v1195_v35 = vld [vmem:[%s1570_s0 + $0x78] sm:$0xff]  }
   0xc   :  { %1158 = vmatpush3.bf16.msra.mxu1 %v1204_v22  ;;  %v1205_v34 = vld [vmem:[%s1570_s0 + $0xf0] sm:$0xff]   ;;  %v1198_v36 = vld [vmem:[%s1570_s0 + $0x80] sm:$0xff]   ;;  %v1206_v37 = vld [vmem:[%s1570_s0 + $0xf8] sm:$0xff]  }
   0xd   :  { %1159 = vmatprep.subr.bf16.mxu1 %v1214_v5  ;;  %v1200_v38 = vld [vmem:[%s1570_s0 + $0x88] sm:$0xff]   ;;  %v1209_v39 = vld [vmem:[%s1572_s2] sm:$0xff]  }
   0xe   :  { %1096 = vmatmul.mubr.msk.bf16.gmra.mxu0 %vm248_vm1, %v1176_v6  ;;  %1132 = vmatmul.mubr.msk.bf16.gmra.mxu1 %vm248_vm1, %v1188_v13 }
   0xf   :  { %1099 = vmatprep.mubr.msk.bf16.mxu0 %vm248_vm1, %v1177_v7  ;;  %1135 = vmatprep.mubr.msk.bf16.mxu1 %vm248_vm1, %v1190_v14 }
  0x10   :  { %1160 = vmatpush3.bf16.msra.mxu1 %v1207_v25 }
  0x11   :  { %1161 = vmatprep.subr.bf16.mxu1 %v1214_v5 }
  0x14   :  { %1162 = vmatpush3.bf16.msra.mxu1 %v1208_v26 }
  0x16   :  { %1100 = vmatmul.mubr.msk.bf16.gmra.mxu0 %vm248_vm1, %v1178_v11  ;;  %1136 = vmatmul.mubr.msk.bf16.gmra.mxu1 %vm248_vm1, %v1192_v18 }
  0x17   :  { %1103 = vmatprep.mubr.msk.bf16.mxu0 %vm248_vm1, %v1179_v12  ;;  %1139 = vmatprep.mubr.msk.bf16.mxu1 %vm248_vm1, %v1194_v19 }
  0x1e   :  { %1104 = vmatmul.mubr.msk.bf16.gmra.mxu0 %vm248_vm1, %v1180_v15  ;;  %1140 = vmatmul.mubr.msk.bf16.gmra.mxu1 %vm248_vm1, %v1196_v23 }
  0x1f   :  { %1107 = vmatprep.mubr.msk.bf16.mxu0 %vm248_vm1, %v1181_v16  ;;  %1143 = vmatprep.mubr.msk.bf16.mxu1 %vm248_vm1, %v1199_v24 }
  0x26   :  { %1108 = vmatmul.mubr.msk.bf16.gmra.mxu0 %vm248_vm1, %v1183_v20  ;;  %1144 = vmatmul.mubr.msk.bf16.gmra.mxu1 %vm248_vm1, %v1201_v29 }
  0x27   :  { %1111 = vmatprep.mubr.msk.bf16.mxu0 %vm248_vm1, %v1185_v21  ;;  %1147 = vmatprep.mubr.msk.bf16.mxu1 %vm248_vm1, %v1202_v30 }
  0x2e   :  { %1112 = vmatmul.mubr.msk.bf16.gmra.mxu0 %vm248_vm1, %v1187_v27  ;;  %1148 = vmatmul.mubr.msk.bf16.gmra.mxu1 %vm248_vm1, %v1203_v33 }
  0x2f   :  { %1115 = vmatprep.mubr.msk.bf16.mxu0 %vm248_vm1, %v1189_v28  ;;  %1151 = vmatprep.mubr.msk.bf16.mxu1 %vm248_vm1, %v1205_v34 }
  0x36   :  { %1116 = vmatmul.mubr.msk.bf16.gmra.mxu0 %vm248_vm1, %v1191_v31  ;;  %1152 = vmatmul.mubr.msk.bf16.gmra.mxu1 %vm248_vm1, %v1206_v37 }
  0x37   :  { %1119 = vmatprep.mubr.msk.bf16.mxu0 %vm248_vm1, %v1193_v32  ;;  %1163 = vmatprep.mubr.msk.bf16.mxu1 %vm1215_vm2, %v1214_v5 }
  0x3e   :  { %1120 = vmatmul.mubr.msk.bf16.gmra.mxu0 %vm248_vm1, %v1195_v35  ;;  %1164 = vmatmul.mubr.msk.bf16.vlgmr.msra.gmra.mxu1 %vm702_vm3, %v1209_v39 }
  0x3f   :  { %1123 = vmatprep.mubr.msk.bf16.mxu0 %vm248_vm1, %v1198_v36 }
  0x46   :  { %1124 = vmatmul.mubr.msk.bf16.gmra.mxu0 %vm248_vm1, %v1200_v38 }
  0xc6   :  { %v1093_v40 = vpop.f32.mrf.mxu0  ;;  %v1405_v51 = vpop.f32.mrf.mxu1 }
  0xc7   :  { %v640_v45 = vmax.f32 %v1093_v40, 0.0 }
  0xc8   :  { %v383_v41 = vpop.f32.mrf.mxu0  ;;  %v1408_v56 = vpop.f32.mrf.mxu1 }
  0xc9   :  { %v638_v43 = vmax.f32 %v383_v41, 0.0  ;;  %v706_v54 = vsel %vm702_vm3, %v640_v45, 0.0 }
  0xca   :  { %v1094_v42 = vpop.f32.mrf.mxu0  ;;  %v1411_v60 = vpop.f32.mrf.mxu1 }
  0xcb   :  { %v703_v48 = vsel %vm702_vm3, %v638_v43, 0.0  ;;  %v641_v49 = vmax.f32 %v1094_v42, 0.0 }
  0xcc   :  { %v386_v44 = vpop.f32.mrf.mxu0  ;;  %v1414_v2 = vpop.f32.mrf.mxu1 }
  0xcd   :  { %v639_v46 = vmax.f32 %v386_v44, 0.0  ;;  %v708_v59 = vsel %vm702_vm3, %v641_v49, 0.0 }
  0xce   :  { %v1097_v47 = vpop.f32.mrf.mxu0  ;;  %v1417_v7 = vpop.f32.mrf.mxu1 }
  0xcf   :  { %v704_v50 = vsel %vm702_vm3, %v639_v46, 0.0  ;;  %v644_v63 = vmax.f32 %v1097_v47, 0.0 }
  0xd0   :  { %v705_v52 = vadd.f32 %v704_v50, %v703_v48  ;;  %v399_v53 = vpop.f32.mrf.mxu0  ;;  %v1420_v12 = vpop.f32.mrf.mxu1 }
  0xd1   :  { %v642_v55 = vmax.f32 %v399_v53, 0.0  ;;  %v714_v10 = vsel %vm702_vm3, %v644_v63, 0.0 }
  0xd2   :  { %v707_v57 = vadd.f32 %v706_v54, %v705_v52  ;;  %v1098_v58 = vpop.f32.mrf.mxu0  ;;  %v1423_v16 = vpop.f32.mrf.mxu1 }
  0xd3   :  { %v710_v0 = vsel %vm702_vm3, %v642_v55, 0.0  ;;  %v645_v5 = vmax.f32 %v1098_v58, 0.0 }
  0xd4   :  { %v709_v61 = vadd.f32 %v708_v59, %v707_v57  ;;  %v402_v62 = vpop.f32.mrf.mxu0  ;;  %v1426_v22 = vpop.f32.mrf.mxu1 }
  0xd5   :  { %v643_v1 = vmax.f32 %v402_v62, 0.0  ;;  %v716_v15 = vsel %vm702_vm3, %v645_v5, 0.0 }
  0xd6   :  { %v711_v3 = vadd.f32 %v710_v0, %v709_v61  ;;  %v1101_v4 = vpop.f32.mrf.mxu0  ;;  %v1429_v27 = vpop.f32.mrf.mxu1 }
  0xd7   :  { %v712_v6 = vsel %vm702_vm3, %v643_v1, 0.0  ;;  %v648_v19 = vmax.f32 %v1101_v4, 0.0 }
  0xd8   :  { %v713_v8 = vadd.f32 %v712_v6, %v711_v3  ;;  %v415_v9 = vpop.f32.mrf.mxu0  ;;  %v1432_v32 = vpop.f32.mrf.mxu1 }
  0xd9   :  { %v646_v11 = vmax.f32 %v415_v9, 0.0  ;;  %v722_v30 = vsel %vm702_vm3, %v648_v19, 0.0 }
  0xda   :  { %v715_v13 = vadd.f32 %v714_v10, %v713_v8  ;;  %v1102_v14 = vpop.f32.mrf.mxu0  ;;  %v1435_v36 = vpop.f32.mrf.mxu1 }
  0xdb   :  { %v718_v20 = vsel %vm702_vm3, %v646_v11, 0.0  ;;  %v649_v25 = vmax.f32 %v1102_v14, 0.0 }
  0xdc   :  { %v717_v17 = vadd.f32 %v716_v15, %v715_v13  ;;  %v418_v18 = vpop.f32.mrf.mxu0  ;;  %v1438_v42 = vpop.f32.mrf.mxu1 }
  0xdd   :  { %v647_v21 = vmax.f32 %v418_v18, 0.0  ;;  %v724_v35 = vsel %vm702_vm3, %v649_v25, 0.0 }
  0xde   :  { %v719_v23 = vadd.f32 %v718_v20, %v717_v17  ;;  %v1105_v24 = vpop.f32.mrf.mxu0  ;;  %v1441_v47 = vpop.f32.mrf.mxu1 }
  0xdf   :  { %v720_v26 = vsel %vm702_vm3, %v647_v21, 0.0  ;;  %v652_v39 = vmax.f32 %v1105_v24, 0.0 }
  0xe0   :  { %v721_v28 = vadd.f32 %v720_v26, %v719_v23  ;;  %v431_v29 = vpop.f32.mrf.mxu0  ;;  %v1444_v53 = vpop.f32.mrf.mxu1 }
  0xe1   :  { %v650_v31 = vmax.f32 %v431_v29, 0.0  ;;  %v730_v50 = vsel %vm702_vm3, %v652_v39, 0.0 }
  0xe2   :  { %v723_v33 = vadd.f32 %v722_v30, %v721_v28  ;;  %v1106_v34 = vpop.f32.mrf.mxu0  ;;  %v1447_v58 = vpop.f32.mrf.mxu1 }
  0xe3   :  { %v726_v40 = vsel %vm702_vm3, %v650_v31, 0.0  ;;  %v653_v45 = vmax.f32 %v1106_v34, 0.0 }
  0xe4   :  { %v725_v37 = vadd.f32 %v724_v35, %v723_v33  ;;  %v434_v38 = vpop.f32.mrf.mxu0  ;;  %v1450_v1 = vpop.f32.mrf.mxu1 }
  0xe5   :  { %v651_v41 = vmax.f32 %v434_v38, 0.0  ;;  %v732_v57 = vsel %vm702_vm3, %v653_v45, 0.0 }
  0xe6   :  { %v727_v43 = vadd.f32 %v726_v40, %v725_v37  ;;  %v1109_v44 = vpop.f32.mrf.mxu0  ;;  %v1453_v8 = vpop.f32.mrf.mxu1 }
  0xe7   :  { %v728_v46 = vsel %vm702_vm3, %v651_v41, 0.0  ;;  %v656_v62 = vmax.f32 %v1109_v44, 0.0 }
  0xe8   :  { %v729_v48 = vadd.f32 %v728_v46, %v727_v43  ;;  %v447_v49 = vpop.f32.mrf.mxu0  ;;  %v1456_v14 = vpop.f32.mrf.mxu1 }
  0xe9   :  { %v654_v52 = vmax.f32 %v447_v49, 0.0  ;;  %v738_v11 = vsel %vm702_vm3, %v656_v62, 0.0 }
  0xea   :  { %v731_v54 = vadd.f32 %v730_v50, %v729_v48  ;;  %v1110_v55 = vpop.f32.mrf.mxu0  ;;  %v1459_v19 = vpop.f32.mrf.mxu1 }
  0xeb   :  { %v734_v63 = vsel %vm702_vm3, %v654_v52, 0.0  ;;  %v657_v5 = vmax.f32 %v1110_v55, 0.0 }
  0xec   :  { %v733_v59 = vadd.f32 %v732_v57, %v731_v54  ;;  %v450_v61 = vpop.f32.mrf.mxu0  ;;  %v1462_v26 = vpop.f32.mrf.mxu1 }
  0xed   :  { %v655_v0 = vmax.f32 %v450_v61, 0.0  ;;  %v740_v18 = vsel %vm702_vm3, %v657_v5, 0.0 }
  0xee   :  { %v735_v3 = vadd.f32 %v734_v63, %v733_v59  ;;  %v1113_v4 = vpop.f32.mrf.mxu0  ;;  %v1465_v33 = vpop.f32.mrf.mxu1 }
  0xef   :  { %v736_v6 = vsel %vm702_vm3, %v655_v0, 0.0  ;;  %v660_v23 = vmax.f32 %v1113_v4, 0.0 }
  0xf0   :  { %v737_v9 = vadd.f32 %v736_v6, %v735_v3  ;;  %v463_v10 = vpop.f32.mrf.mxu0  ;;  %v1468_v39 = vpop.f32.mrf.mxu1 }
  0xf1   :  { %v658_v13 = vmax.f32 %v463_v10, 0.0  ;;  %v746_v37 = vsel %vm702_vm3, %v660_v23, 0.0 }
  0xf2   :  { %v739_v15 = vadd.f32 %v738_v11, %v737_v9  ;;  %v1114_v17 = vpop.f32.mrf.mxu0  ;;  %v1471_v44 = vpop.f32.mrf.mxu1 }
  0xf3   :  { %v742_v24 = vsel %vm702_vm3, %v658_v13, 0.0  ;;  %v661_v30 = vmax.f32 %v1114_v17, 0.0 }
  0xf4   :  { %v741_v20 = vadd.f32 %v740_v18, %v739_v15  ;;  %v466_v21 = vpop.f32.mrf.mxu0  ;;  %v1474_v52 = vpop.f32.mrf.mxu1 }
  0xf5   :  { %v659_v25 = vmax.f32 %v466_v21, 0.0  ;;  %v748_v43 = vsel %vm702_vm3, %v661_v30, 0.0  ;;  %v1040_v21 = vld [vmem:[%s1573_s4] ss:$0 sm:$0xff] }
  0xf6   :  { %v743_v28 = vadd.f32 %v742_v24, %v741_v20  ;;  %v1117_v29 = vpop.f32.mrf.mxu0  ;;  %v1477_v61 = vpop.f32.mrf.mxu1 }
  0xf7   :  { %v744_v31 = vsel %vm702_vm3, %v659_v25, 0.0  ;;  %v664_v48 = vmax.f32 %v1117_v29, 0.0 }
  0xf8   :  { %v745_v34 = vadd.f32 %v744_v31, %v743_v28  ;;  %v479_v35 = vpop.f32.mrf.mxu0  ;;  %v1480_v4 = vpop.f32.mrf.mxu1 }
  0xf9   :  { %v662_v38 = vmax.f32 %v479_v35, 0.0  ;;  %v754_v0 = vsel %vm702_vm3, %v664_v48, 0.0 }
  0xfa   :  { %v747_v40 = vadd.f32 %v746_v37, %v745_v34  ;;  %v1118_v41 = vpop.f32.mrf.mxu0  ;;  %v1483_v10 = vpop.f32.mrf.mxu1 }
  0xfb   :  { %v750_v49 = vsel %vm702_vm3, %v662_v38, 0.0  ;;  %v665_v57 = vmax.f32 %v1118_v41, 0.0 }
  0xfc   :  { %v749_v45 = vadd.f32 %v748_v43, %v747_v40  ;;  %v482_v46 = vpop.f32.mrf.mxu0  ;;  %v1486_v20 = vpop.f32.mrf.mxu1 }
  0xfd   :  { %v663_v50 = vmax.f32 %v482_v46, 0.0  ;;  %v756_v9 = vsel %vm702_vm3, %v665_v57, 0.0 }
  0xfe   :  { %v751_v54 = vadd.f32 %v750_v49, %v749_v45  ;;  %v1121_v55 = vpop.f32.mrf.mxu0  ;;  %v932_v29 = vpop.f32.mrf.mxu1 }
  0xff   :  { %v752_v59 = vsel %vm702_vm3, %v663_v50, 0.0  ;;  %v668_v15 = vmax.f32 %v1121_v55, 0.0  ;;  %v933_v34 = vadd.f32 %v1040_v21, %v932_v29  ;;  %v676_v29 = vmax.f32 %v1405_v51, 0.0 }
 0x100   :  { %v753_v62 = vadd.f32 %v752_v59, %v751_v54  ;;  %v495_v63 = vpop.f32.mrf.mxu0  ;;  %v1165_v37 = vpop.f32.mrf.mxu1 }
 0x101   :  { %v666_v3 = vmax.f32 %v495_v63, 0.0  ;;  %v762_v35 = vsel %vm702_vm3, %v668_v15, 0.0  ;;  %v941_v41 = vmul.f32 0.044715, %v933_v34 }
 0x102   :  { %v755_v5 = vadd.f32 %v754_v0, %v753_v62  ;;  %v1122_v6 = vpop.f32.mrf.mxu0  ;;  %v935_v46 = vpop.f32.mrf.mxu1 }
 0x103   :  { %v758_v17 = vsel %vm702_vm3, %v666_v3, 0.0  ;;  %v669_v25 = vmax.f32 %v1122_v6, 0.0  ;;  %v943_v50 = vmul.f32 %v941_v41, %v933_v34  ;;  %v936_v54 = vadd.f32 %v1040_v21, %v935_v46 }
 0x104   :  { %v757_v11 = vadd.f32 %v756_v9, %v755_v5  ;;  %v498_v13 = vpop.f32.mrf.mxu0  ;;  %v1166_v59 = vpop.f32.mrf.mxu1  ;;  %v680_v46 = vmax.f32 %v1417_v7, 0.0  ;;  %v683_v7 = vmax.f32 %v1438_v42, 0.0 }
 0x105   :  { %v667_v18 = vmax.f32 %v498_v13, 0.0  ;;  %v764_v43 = vsel %vm702_vm3, %v669_v25, 0.0  ;;  %v945_v62 = vmul.f32 %v943_v50, %v933_v34  ;;  %v942_v63 = vmul.f32 0.044715, %v936_v54 }
 0x106   :  { %v759_v23 = vadd.f32 %v758_v17, %v757_v11  ;;  %v1125_v24 = vpop.f32.mrf.mxu0  ;;  %v674_v13 = vmax.f32 %v1408_v56, 0.0  ;;  %v677_v56 = vmax.f32 %v1411_v60, 0.0  ;;  %v681_v60 = vmax.f32 %v1423_v16, 0.0 }
 0x107   :  { %v760_v28 = vsel %vm702_vm3, %v667_v18, 0.0  ;;  %v672_v55 = vmax.f32 %v1125_v24, 0.0  ;;  %v947_v9 = vadd.f32 %v945_v62, %v933_v34  ;;  %v944_v11 = vmul.f32 %v942_v63, %v936_v54 }
 0x108   :  { %v761_v30 = vadd.f32 %v760_v28, %v759_v23  ;;  %v511_v31 = vpop.f32.mrf.mxu0  ;;  %v675_v23 = vmax.f32 %v1414_v2, 0.0  ;;  %v678_v2 = vmax.f32 %v1420_v12, 0.0  ;;  %v939_v59 = vmul.f32 0.5, %v933_v34 }
 0x109   :  { %v670_v45 = vmax.f32 %v511_v31, 0.0  ;;  %v777_v15 = vsel %vm702_vm3, %v672_v55, 0.0  ;;  %v949_v18 = vmul.f32 0.7978846, %v947_v9  ;;  %v946_v21 = vmul.f32 %v944_v11, %v936_v54 }
 0x10a   :  { %v763_v38 = vadd.f32 %v762_v35, %v761_v30  ;;  %v1126_v40 = vpop.f32.mrf.mxu0  ;;  %v781_v30 = vsel %vm702_vm3, %v674_v13, 0.0  ;;  %v783_v37 = vsel %vm702_vm3, %v675_v23, 0.0  ;;  %v793_v12 = vsel %vm702_vm3, %v680_v46, 0.0 }
 0x10b   :  { %v774_v0 = vsel %vm702_vm3, %v670_v45, 0.0  ;;  %v673_v3 = vmax.f32 %v1126_v40, 0.0  ;;  %1210 = vtanh.f32 %v949_v18  ;;  %v948_v28 = vadd.f32 %v946_v21, %v936_v54 }
 0x10c   :  { %v1494_v48 = vadd.f32 %v764_v43, %v763_v38  ;;  %v514_v49 = vpop.f32.mrf.mxu0  ;;  %v785_v40 = vsel %vm702_vm3, %v676_v29, 0.0  ;;  %v787_v43 = vsel %vm702_vm3, %v677_v56, 0.0  ;;  %v679_v45 = vmax.f32 %v1426_v22, 0.0 }
 0x10d   :  { %v671_v57 = vmax.f32 %v514_v49, 0.0  ;;  %v779_v24 = vsel %vm702_vm3, %v673_v3, 0.0  ;;  %v950_v35 = vmul.f32 0.7978846, %v948_v28  ;;  %v789_v49 = vsel %vm702_vm3, %v678_v2, 0.0 }
 0x10e   :  { %v791_v55 = vsel %vm702_vm3, %v679_v45, 0.0  ;;  %v682_v63 = vmax.f32 %v1432_v32, 0.0  ;;  %v795_v22 = vsel %vm702_vm3, %v681_v60, 0.0  ;;  %v940_v9 = vmul.f32 0.5, %v936_v54 }
 0x10f   :  { %v775_v5 = vsel %vm702_vm3, %v671_v57, 0.0  ;;  %1212 = vtanh.f32 %v950_v35  ;;  %v684_v16 = vmax.f32 %v1429_v27, 0.0  ;;  %v685_v32 = vmax.f32 %v1435_v36, 0.0 }
 0x110   :  { %v776_v6 = vadd.f32 %v775_v5, %v774_v0  ;;  %v797_v13 = vsel %vm702_vm3, %v682_v63, 0.0  ;;  %v799_v18 = vsel %vm702_vm3, %v683_v7, 0.0  ;;  %v686_v27 = vmax.f32 %v1444_v53, 0.0 }
 0x111   :  { %v801_v54 = vsel %vm702_vm3, %v684_v16, 0.0  ;;  %v687_v28 = vmax.f32 %v1450_v1, 0.0  ;;  %v688_v29 = vmax.f32 %v1441_v47, 0.0  ;;  %v689_v35 = vmax.f32 %v1447_v58, 0.0 }
 0x112   :  { %v778_v17 = vadd.f32 %v777_v15, %v776_v6  ;;  %v690_v1 = vmax.f32 %v1456_v14, 0.0  ;;  %v691_v2 = vmax.f32 %v1462_v26, 0.0  ;;  %v692_v47 = vmax.f32 %v1453_v8, 0.0 }
 0x113   :  { %v807_v53 = vsel %vm702_vm3, %v687_v28, 0.0  ;;  %v693_v58 = vmax.f32 %v1459_v19, 0.0  ;;  %v694_v14 = vmax.f32 %v1468_v39, 0.0  ;;  %v695_v26 = vmax.f32 %v1474_v52, 0.0 }
 0x114   :  { %v780_v25 = vadd.f32 %v779_v24, %v778_v17  ;;  %v696_v8 = vmax.f32 %v1465_v33, 0.0  ;;  %v697_v19 = vmax.f32 %v1471_v44, 0.0  ;;  %v698_v39 = vmax.f32 %v1480_v4, 0.0 }
 0x115   :  { %v819_v60 = vsel %vm702_vm3, %v693_v58, 0.0  ;;  %v700_v7 = vmax.f32 %v1477_v61, 0.0 }
 0x116   :  { %v782_v31 = vadd.f32 %v781_v30, %v780_v25  ;;  %v803_v25 = vsel %vm702_vm3, %v685_v32, 0.0  ;;  %v805_v30 = vsel %vm702_vm3, %v686_v27, 0.0  ;;  %v825_v63 = vsel %vm702_vm3, %v696_v8, 0.0 }
 0x117   :  { %v827_v52 = vsel %vm702_vm3, %v697_v19, 0.0  ;;  %v833_v16 = vsel %vm702_vm3, %v700_v7, 0.0 }
 0x118   :  { %v784_v38 = vadd.f32 %v783_v37, %v782_v31  ;;  %v1211_v62 = vpop.eup %1210  ;;  %v809_v37 = vsel %vm702_vm3, %v688_v29, 0.0 }
 0x119   :  { %v953_v3 = vadd.f32 1.0, %v1211_v62  ;;  %v823_v62 = vsel %vm702_vm3, %v695_v26, 0.0 }
 0x11a   :  { %v786_v41 = vadd.f32 %v785_v40, %v784_v38  ;;  %v811_v40 = vsel %vm702_vm3, %v689_v35, 0.0 }
 0x11b   :  { %v955_v6 = vmul.f32 %v953_v3, %v939_v59 }
 0x11c   :  { %v788_v51 = vadd.f32 %v787_v43, %v786_v41  ;;  %v1213_v11 = vpop.eup %1212  ;;  %v813_v43 = vsel %vm702_vm3, %v690_v1, 0.0 }
 0x11d   :  { %v1049_v15 = vpack.c.bf16 %v955_v6, %v955_v6  ;;  %v954_v17 = vadd.f32 1.0, %v1213_v11 }
 0x11e   :  { %v790_v50 = vadd.f32 %v789_v49, %v788_v51  ;;  %v815_v51 = vsel %vm702_vm3, %v691_v2, 0.0  ;;  %v817_v49 = vsel %vm702_vm3, %v692_v47, 0.0 }
 0x11f   :  { %966 = vst.msk [vmem:[%s1574_s6] sm:$0xf] %vm965_vm4, %v1049_v15  ;;  %v956_v42 = vmul.f32 %v954_v17, %v940_v9  ;;  %v701_v9 = vmax.f32 %v1483_v10, 0.0 }
 0x120   :  { %v792_v57 = vadd.f32 %v791_v55, %v790_v50 }
 0x121   :  { %v1050_v24 = vpack.c.bf16 %v956_v42, %v956_v42  ;;  %v835_v15 = vsel %vm702_vm3, %v701_v9, 0.0 }
 0x122   :  { %v794_v0 = vadd.f32 %v793_v12, %v792_v57  ;;  %v821_v57 = vsel %vm702_vm3, %v694_v14, 0.0 }
 0x123   :  { %967 = vst.msk [vmem:[%s1574_s6 + $0x4] sm:$0xf] %vm965_vm4, %v1050_v24 }
 0x124   :  { %v796_v5 = vadd.f32 %v795_v22, %v794_v0  ;;  %v766_v0 = vrot.slane %v1494_v48, 4  ;;  %v699_v22 = vmax.f32 %v1486_v20, 0.0 }
 0x126   :  { %v798_v34 = vadd.f32 %v797_v13, %v796_v5  ;;  %v829_v5 = vsel %vm702_vm3, %v698_v39, 0.0  ;;  %v767_v44 = vadd.f32 %v766_v0, %v1494_v48  ;;  %v831_v11 = vsel %vm702_vm3, %v699_v22, 0.0 }
 0x128   :  { %v800_v21 = vadd.f32 %v799_v18, %v798_v34  ;;  %v768_v13 = vrot.slane %v767_v44, 2 }
 0x12a   :  { %v802_v23 = vadd.f32 %v801_v54, %v800_v21  ;;  %v769_v17 = vadd.f32 %v768_v13, %v767_v44 }
 0x12c   :  { %v804_v36 = vadd.f32 %v803_v25, %v802_v23  ;;  %v770_v18 = vrot.slane %v769_v17, 1 }
 0x12e   :  { %v806_v31 = vadd.f32 %v805_v30, %v804_v36  ;;  %v771_v48 = vadd.f32 %v770_v18, %v769_v17 }
 0x130   :  { %v808_v56 = vadd.f32 %v807_v53, %v806_v31  ;;  %v773_v10 = vmul.f32 0.00390625, %v771_v48 }
 0x132   :  { %v810_v38 = vadd.f32 %v809_v37, %v808_v56 }
 0x134   :  { %v812_v41 = vadd.f32 %v811_v40, %v810_v38 }
 0x136   :  { %v814_v45 = vadd.f32 %v813_v43, %v812_v41 }
 0x138   :  { %v816_v46 = vadd.f32 %v815_v51, %v814_v45 }
 0x13a   :  { %v818_v50 = vadd.f32 %v817_v49, %v816_v46 }
 0x13c   :  { %v820_v55 = vadd.f32 %v819_v60, %v818_v50 }
 0x13e   :  { %v822_v59 = vadd.f32 %v821_v57, %v820_v55 }
 0x140   :  { %v824_v12 = vadd.f32 %v823_v62, %v822_v59 }
 0x142   :  { %v826_v3 = vadd.f32 %v825_v63, %v824_v12 }
 0x144   :  { %v828_v33 = vadd.f32 %v827_v52, %v826_v3 }
 0x146   :  { %v830_v6 = vadd.f32 %v829_v5, %v828_v33 }
 0x148   :  { %v832_v4 = vadd.f32 %v831_v11, %v830_v6 }
 0x14a   :  { %v834_v34 = vadd.f32 %v833_v16, %v832_v4 }
 0x14c   :  { %v836_v20 = vadd.f32 %v835_v15, %v834_v34 }
 0x14e   :  { %v837_v32 = vrot.slane %v836_v20, 4 }
 0x150   :  { %v838_v61 = vadd.f32 %v837_v32, %v836_v20 }
 0x152   :  { %v839_v21 = vrot.slane %v838_v61, 2 }
 0x154   :  { %v840_v42 = vadd.f32 %v839_v21, %v838_v61 }
 0x156   :  { %v841_v54 = vrot.slane %v840_v42, 1 }
 0x158   :  { %v842_v27 = vadd.f32 %v841_v54, %v840_v42 }
 0x15a   :  { %v843_v23 = vmul.f32 0.00390625, %v842_v27 }
 0x15c   :  { %v845_v24 = vsel %vm844_vm5, %v773_v10, %v843_v23 }
 0x15d   :  { %v846_v25 = vpack.c.bf16 %v845_v24, %v845_v24 }
 0x15f   :  { %848 = vst.msk [vmem:[%s1575_s5] sm:$0x1] %vm847_vm6, %v846_v25 }

</bundles_post_ra>
